<compile_context>
chip_gen: v5e
topology: v5e:2x2
jax: 0.10.0
libtpu: 0.0.40
codegen_flags: <defaults>
</compile_context>

<pallas_src>
import functools

import jax
import jax.numpy as jnp
from jax import lax
from jax.experimental import pallas as pl
from jax.experimental.pallas import tpu as pltpu

_LANES = 128


def _fake_nonlinear_kernel(params_ref, x_ref, o_ref, *, T, n_neurons,
                           chunk_rows, n_chunks):
    # params_ref: (4, N) f32 in SMEM, rows = [a=w1*T/thr, c=b1*T/thr,
    #                                         d=w2*thr/T, b2 (broadcast)]
    # x_ref/o_ref: (tr, 128) f32 in VMEM (flattened batch on the lane axis).
    T_f = jnp.float32(T)
    b2 = params_ref[3, 0]

    def chunk_body(cidx, carry):
        r0 = pl.multiple_of(cidx * chunk_rows, chunk_rows)
        x = x_ref[pl.ds(r0, chunk_rows), :]          # (chunk_rows, 128) in vregs
        acc = jnp.zeros_like(x)

        def neuron_step(j, acc):
            a = params_ref[0, j]
            c = params_ref[1, j]
            d = params_ref[2, j]
            # Closed form of T IF/soft-reset steps under constant input:
            #   spikes = clip(floor(T*y/thr), 0, T);  contribution = spikes*d.
            return acc + jnp.clip(jnp.floor(x * a + c), 0.0, T_f) * d

        if n_neurons <= 64:
            # Fully unroll (static N): amortizes loop control / SMEM reads and
            # lets floor/min/max latencies overlap across neurons.
            for j in range(n_neurons):
                acc = neuron_step(j, acc)
        else:
            acc = lax.fori_loop(0, n_neurons, neuron_step, acc, unroll=8)

        o_ref[pl.ds(r0, chunk_rows), :] = (acc + b2).astype(o_ref.dtype)
        return carry

    lax.fori_loop(0, n_chunks, chunk_body, 0)


def fake_nonlinear_op(x, w1, b1, w2, b2, threshold, *, T,
                      block_rows=2048, chunk_rows=64):
    """x: arbitrary shape; returns same shape (matches squeeze(-1) of [..., 1])."""
    x = jnp.asarray(x)
    orig_shape = x.shape
    orig_dtype = x.dtype
    out_dtype = orig_dtype if jnp.issubdtype(orig_dtype, jnp.floating) else jnp.float32
    M = int(x.size)
    N = int(jnp.asarray(w1).size)

    # ---- lane-dense layout: flattened batch lives on the 128-lane axis ----
    rows_needed = max(1, pl.cdiv(M, _LANES))
    grid_n = max(1, pl.cdiv(rows_needed, block_rows))
    if grid_n < 2 and rows_needed >= 16:
        grid_n = 2                      # v7x: feed both TensorCores; harmless on v5e/v6e
    tr = ((pl.cdiv(rows_needed, grid_n) + 7) // 8) * 8   # tile rows, multiple of 8
    rows = grid_n * tr                                   # padding bounded per step

    cr = max(8, (min(chunk_rows, tr) // 8) * 8)          # in-kernel chunk rows
    while tr % cr != 0:                                  # make cr divide tr
        cr -= 8
    n_chunks = tr // cr

    m_pad = rows * _LANES
    xflat = x.reshape(-1).astype(jnp.float32)
    xm = jnp.pad(xflat, (0, m_pad - M)).reshape(rows, _LANES)

    # ---- host-side folded per-neuron constants (packed into SMEM) ----
    T_f = jnp.float32(T)
    thr = jnp.broadcast_to(jnp.asarray(threshold, jnp.float32).reshape(-1), (N,))
    w1v = jnp.asarray(w1, jnp.float32).reshape(N)        # fc1.weight (N,1) -> (N,)
    b1v = jnp.asarray(b1, jnp.float32).reshape(N)        # fc1.bias
    w2v = jnp.asarray(w2, jnp.float32).reshape(N)        # fc2.weight (1,N) -> (N,)
    b2s = jnp.asarray(b2, jnp.float32).reshape(-1)[0]    # fc2.bias
    params = jnp.stack(
        [
            w1v * (T_f / thr),                           # a_j
            b1v * (T_f / thr),                           # c_j
            w2v * (thr / T_f),                           # d_j
            jnp.broadcast_to(b2s, (N,)),                 # b2
        ],
        axis=0,
    )                                                    # (4, N) -> SMEM

    cost = pl.CostEstimate(
        flops=8 * N * rows * _LANES,
        transcendentals=0,
        bytes_accessed=8 * rows * _LANES,
    )

    out = pl.pallas_call(
        functools.partial(
            _fake_nonlinear_kernel,
            T=T, n_neurons=N, chunk_rows=cr, n_chunks=n_chunks),
        out_shape=jax.ShapeDtypeStruct((rows, _LANES), out_dtype),
        grid=(grid_n,),
        in_specs=[
            pl.BlockSpec(memory_space=pltpu.MemorySpace.SMEM),  # packed params
            pl.BlockSpec((tr, _LANES), lambda i: (i, 0)),       # x tile
        ],
        out_specs=pl.BlockSpec((tr, _LANES), lambda i: (i, 0)),
        compiler_params=pltpu.CompilerParams(
            dimension_semantics=("parallel",)),
        cost_estimate=cost,
    )(params, xm)

    return out.reshape(-1)[:M].reshape(orig_shape).astype(orig_dtype)


def _reference(x, w1, b1, w2, b2, threshold, T):
    """Pure-JAX reference: the original per-step IF/soft-reset loop."""
    xm = jnp.asarray(x, jnp.float32).reshape(-1, 1)
    w1r = jnp.asarray(w1, jnp.float32).reshape(1, -1)
    b1r = jnp.asarray(b1, jnp.float32).reshape(1, -1)
    w2r = jnp.asarray(w2, jnp.float32).reshape(-1, 1)
    b2r = jnp.asarray(b2, jnp.float32).reshape(1, 1)
    thr = jnp.asarray(threshold, jnp.float32).reshape(1, -1)

    y = xm * w1r + b1r
    v = jnp.zeros_like(y)
    acc = jnp.zeros_like(y)
    for _ in range(T):
        v = v + y
        spike = (v >= thr).astype(y.dtype)
        emitted = spike * thr
        v = v - emitted
        acc = acc + emitted
    rate = acc / T
    z = rate @ w2r + b2r
    return z.reshape(jnp.asarray(x).shape)


if __name__ == "__main__":
    n_neurons = 32
    T = 4
    batch, seq = 2, 8                                  # x: (2, 8) -> M = 16 elements

    key = jax.random.PRNGKey(0)
    k_x, k_w1, k_b1, k_w2, k_b2, k_x2 = jax.random.split(key, 6)

    # Deterministic parameter init (PyTorch Linear default: U(-1/sqrt(fan_in), +)).
    w1 = jax.random.uniform(k_w1, (n_neurons,), minval=-1.0, maxval=1.0)  # fan_in=1
    b1 = jax.random.uniform(k_b1, (n_neurons,), minval=-1.0, maxval=1.0)
    bound2 = 1.0 / float(jnp.sqrt(jnp.float32(n_neurons)))
    w2 = jax.random.uniform(k_w2, (n_neurons,), minval=-bound2, maxval=bound2)
    b2 = jax.random.uniform(k_b2, (1,), minval=-bound2, maxval=bound2)
    threshold = jnp.full((n_neurons,), 0.75, dtype=jnp.float32)           # clip.threshold

    # Case 1: small 2-D input (matches the module's typical call).
    x = jax.random.normal(k_x, (batch, seq), dtype=jnp.float32)
    y = fake_nonlinear_op(x, w1, b1, w2, b2, threshold, T=T)
    jax.block_until_ready(y)
    assert y.shape == x.shape and y.dtype == jnp.float32
    y_ref = _reference(x, w1, b1, w2, b2, threshold, T)
    assert float(jnp.max(jnp.abs(y - y_ref))) < 1e-4

    # Case 2: non-multiple-of-128 size exercising padding and a multi-step grid.
    x2 = jax.random.normal(k_x2, (4, 1000), dtype=jnp.float32)
    y2 = fake_nonlinear_op(x2, w1, b1, w2, b2, threshold, T=T, block_rows=8)
    jax.block_until_ready(y2)
    assert y2.shape == x2.shape
    y2_ref = _reference(x2, w1, b1, w2, b2, threshold, T)
    assert float(jnp.max(jnp.abs(y2 - y2_ref))) < 1e-4

    print("KERNEL_OK")
</pallas_src>

<mosaic_0001>
module attributes {stable_mosaic.version = 11 : i64} {
  func.func @_fake_nonlinear_kernel(%arg0: i32, %arg1: memref<4x32xf32, #tpu.memory_space<smem>>, %arg2: memref<8x128xf32, #tpu.memory_space<vmem>>, %arg3: memref<8x128xf32, #tpu.memory_space<vmem>>) attributes {dimension_semantics = [#tpu.dimension_semantics<parallel>], iteration_bounds = array<i64: 1>, scalar_prefetch = 0 : i64, scratch_operands = 0 : i64, tpu.core_type = #tpu.core_type<tc>, window_params = [{transform_indices = @transform_0, window_bounds = array<i64: 4, 32>}, {transform_indices = @transform_1, window_bounds = array<i64: 8, 128>}, {transform_indices = @transform_2, window_bounds = array<i64: 8, 128>}]} {
    %c3 = arith.constant 3 : index
    %c0 = arith.constant 0 : index
    %0 = memref.load %arg1[%c3, %c0] : memref<4x32xf32, #tpu.memory_space<smem>>
    %cst = arith.constant 4.000000e+00 : f32
    %c0_i32 = arith.constant 0 : i32
    %c8_i32 = arith.constant 8 : i32
    %1 = arith.muli %c0_i32, %c8_i32 : i32
    %2 = tpu.assume_multiple %1, 8 : i32
    %3 = arith.index_cast %2 : i32 to index
    %c0_0 = arith.constant 0 : index
    %4 = vector.load %arg2[%3, %c0_0] : memref<8x128xf32, #tpu.memory_space<vmem>>, vector<8x128xf32>
    %cst_1 = arith.constant 0.000000e+00 : f32
    %5 = vector.broadcast %cst_1 : f32 to vector<8x128xf32>
    %c0_2 = arith.constant 0 : index
    %c0_3 = arith.constant 0 : index
    %6 = memref.load %arg1[%c0_2, %c0_3] : memref<4x32xf32, #tpu.memory_space<smem>>
    %c1 = arith.constant 1 : index
    %c0_4 = arith.constant 0 : index
    %7 = memref.load %arg1[%c1, %c0_4] : memref<4x32xf32, #tpu.memory_space<smem>>
    %c2 = arith.constant 2 : index
    %c0_5 = arith.constant 0 : index
    %8 = memref.load %arg1[%c2, %c0_5] : memref<4x32xf32, #tpu.memory_space<smem>>
    %9 = vector.broadcast %6 : f32 to vector<8x128xf32>
    %10 = arith.mulf %4, %9 : vector<8x128xf32>
    %11 = vector.broadcast %7 : f32 to vector<8x128xf32>
    %12 = arith.addf %10, %11 : vector<8x128xf32>
    %13 = math.floor %12 : vector<8x128xf32>
    %cst_6 = arith.constant 0.000000e+00 : f32
    %14 = vector.broadcast %cst_6 : f32 to vector<8x128xf32>
    %15 = arith.maximumf %14, %13 : vector<8x128xf32>
    %16 = vector.broadcast %cst : f32 to vector<8x128xf32>
    %17 = arith.minimumf %16, %15 : vector<8x128xf32>
    %18 = vector.broadcast %8 : f32 to vector<8x128xf32>
    %19 = arith.mulf %17, %18 : vector<8x128xf32>
    %20 = arith.addf %5, %19 : vector<8x128xf32>
    %c0_7 = arith.constant 0 : index
    %c1_8 = arith.constant 1 : index
    %21 = memref.load %arg1[%c0_7, %c1_8] : memref<4x32xf32, #tpu.memory_space<smem>>
    %c1_9 = arith.constant 1 : index
    %c1_10 = arith.constant 1 : index
    %22 = memref.load %arg1[%c1_9, %c1_10] : memref<4x32xf32, #tpu.memory_space<smem>>
    %c2_11 = arith.constant 2 : index
    %c1_12 = arith.constant 1 : index
    %23 = memref.load %arg1[%c2_11, %c1_12] : memref<4x32xf32, #tpu.memory_space<smem>>
    %24 = vector.broadcast %21 : f32 to vector<8x128xf32>
    %25 = arith.mulf %4, %24 : vector<8x128xf32>
    %26 = vector.broadcast %22 : f32 to vector<8x128xf32>
    %27 = arith.addf %25, %26 : vector<8x128xf32>
    %28 = math.floor %27 : vector<8x128xf32>
    %cst_13 = arith.constant 0.000000e+00 : f32
    %29 = vector.broadcast %cst_13 : f32 to vector<8x128xf32>
    %30 = arith.maximumf %29, %28 : vector<8x128xf32>
    %31 = vector.broadcast %cst : f32 to vector<8x128xf32>
    %32 = arith.minimumf %31, %30 : vector<8x128xf32>
    %33 = vector.broadcast %23 : f32 to vector<8x128xf32>
    %34 = arith.mulf %32, %33 : vector<8x128xf32>
    %35 = arith.addf %20, %34 : vector<8x128xf32>
    %c0_14 = arith.constant 0 : index
    %c2_15 = arith.constant 2 : index
    %36 = memref.load %arg1[%c0_14, %c2_15] : memref<4x32xf32, #tpu.memory_space<smem>>
    %c1_16 = arith.constant 1 : index
    %c2_17 = arith.constant 2 : index
    %37 = memref.load %arg1[%c1_16, %c2_17] : memref<4x32xf32, #tpu.memory_space<smem>>
    %c2_18 = arith.constant 2 : index
    %c2_19 = arith.constant 2 : index
    %38 = memref.load %arg1[%c2_18, %c2_19] : memref<4x32xf32, #tpu.memory_space<smem>>
    %39 = vector.broadcast %36 : f32 to vector<8x128xf32>
    %40 = arith.mulf %4, %39 : vector<8x128xf32>
    %41 = vector.broadcast %37 : f32 to vector<8x128xf32>
    %42 = arith.addf %40, %41 : vector<8x128xf32>
    %43 = math.floor %42 : vector<8x128xf32>
    %cst_20 = arith.constant 0.000000e+00 : f32
    %44 = vector.broadcast %cst_20 : f32 to vector<8x128xf32>
    %45 = arith.maximumf %44, %43 : vector<8x128xf32>
    %46 = vector.broadcast %cst : f32 to vector<8x128xf32>
    %47 = arith.minimumf %46, %45 : vector<8x128xf32>
    %48 = vector.broadcast %38 : f32 to vector<8x128xf32>
    %49 = arith.mulf %47, %48 : vector<8x128xf32>
    %50 = arith.addf %35, %49 : vector<8x128xf32>
    %c0_21 = arith.constant 0 : index
    %c3_22 = arith.constant 3 : index
    %51 = memref.load %arg1[%c0_21, %c3_22] : memref<4x32xf32, #tpu.memory_space<smem>>
    %c1_23 = arith.constant 1 : index
    %c3_24 = arith.constant 3 : index
    %52 = memref.load %arg1[%c1_23, %c3_24] : memref<4x32xf32, #tpu.memory_space<smem>>
    %c2_25 = arith.constant 2 : index
    %c3_26 = arith.constant 3 : index
    %53 = memref.load %arg1[%c2_25, %c3_26] : memref<4x32xf32, #tpu.memory_space<smem>>
    %54 = vector.broadcast %51 : f32 to vector<8x128xf32>
    %55 = arith.mulf %4, %54 : vector<8x128xf32>
    %56 = vector.broadcast %52 : f32 to vector<8x128xf32>
    %57 = arith.addf %55, %56 : vector<8x128xf32>
    %58 = math.floor %57 : vector<8x128xf32>
    %cst_27 = arith.constant 0.000000e+00 : f32
    %59 = vector.broadcast %cst_27 : f32 to vector<8x128xf32>
    %60 = arith.maximumf %59, %58 : vector<8x128xf32>
    %61 = vector.broadcast %cst : f32 to vector<8x128xf32>
    %62 = arith.minimumf %61, %60 : vector<8x128xf32>
    %63 = vector.broadcast %53 : f32 to vector<8x128xf32>
    %64 = arith.mulf %62, %63 : vector<8x128xf32>
    %65 = arith.addf %50, %64 : vector<8x128xf32>
    %c0_28 = arith.constant 0 : index
    %c4 = arith.constant 4 : index
    %66 = memref.load %arg1[%c0_28, %c4] : memref<4x32xf32, #tpu.memory_space<smem>>
    %c1_29 = arith.constant 1 : index
    %c4_30 = arith.constant 4 : index
    %67 = memref.load %arg1[%c1_29, %c4_30] : memref<4x32xf32, #tpu.memory_space<smem>>
    %c2_31 = arith.constant 2 : index
    %c4_32 = arith.constant 4 : index
    %68 = memref.load %arg1[%c2_31, %c4_32] : memref<4x32xf32, #tpu.memory_space<smem>>
    %69 = vector.broadcast %66 : f32 to vector<8x128xf32>
    %70 = arith.mulf %4, %69 : vector<8x128xf32>
    %71 = vector.broadcast %67 : f32 to vector<8x128xf32>
    %72 = arith.addf %70, %71 : vector<8x128xf32>
    %73 = math.floor %72 : vector<8x128xf32>
    %cst_33 = arith.constant 0.000000e+00 : f32
    %74 = vector.broadcast %cst_33 : f32 to vector<8x128xf32>
    %75 = arith.maximumf %74, %73 : vector<8x128xf32>
    %76 = vector.broadcast %cst : f32 to vector<8x128xf32>
    %77 = arith.minimumf %76, %75 : vector<8x128xf32>
    %78 = vector.broadcast %68 : f32 to vector<8x128xf32>
    %79 = arith.mulf %77, %78 : vector<8x128xf32>
    %80 = arith.addf %65, %79 : vector<8x128xf32>
    %c0_34 = arith.constant 0 : index
    %c5 = arith.constant 5 : index
    %81 = memref.load %arg1[%c0_34, %c5] : memref<4x32xf32, #tpu.memory_space<smem>>
    %c1_35 = arith.constant 1 : index
    %c5_36 = arith.constant 5 : index
    %82 = memref.load %arg1[%c1_35, %c5_36] : memref<4x32xf32, #tpu.memory_space<smem>>
    %c2_37 = arith.constant 2 : index
    %c5_38 = arith.constant 5 : index
    %83 = memref.load %arg1[%c2_37, %c5_38] : memref<4x32xf32, #tpu.memory_space<smem>>
    %84 = vector.broadcast %81 : f32 to vector<8x128xf32>
    %85 = arith.mulf %4, %84 : vector<8x128xf32>
    %86 = vector.broadcast %82 : f32 to vector<8x128xf32>
    %87 = arith.addf %85, %86 : vector<8x128xf32>
    %88 = math.floor %87 : vector<8x128xf32>
    %cst_39 = arith.constant 0.000000e+00 : f32
    %89 = vector.broadcast %cst_39 : f32 to vector<8x128xf32>
    %90 = arith.maximumf %89, %88 : vector<8x128xf32>
    %91 = vector.broadcast %cst : f32 to vector<8x128xf32>
    %92 = arith.minimumf %91, %90 : vector<8x128xf32>
    %93 = vector.broadcast %83 : f32 to vector<8x128xf32>
    %94 = arith.mulf %92, %93 : vector<8x128xf32>
    %95 = arith.addf %80, %94 : vector<8x128xf32>
    %c0_40 = arith.constant 0 : index
    %c6 = arith.constant 6 : index
    %96 = memref.load %arg1[%c0_40, %c6] : memref<4x32xf32, #tpu.memory_space<smem>>
    %c1_41 = arith.constant 1 : index
    %c6_42 = arith.constant 6 : index
    %97 = memref.load %arg1[%c1_41, %c6_42] : memref<4x32xf32, #tpu.memory_space<smem>>
    %c2_43 = arith.constant 2 : index
    %c6_44 = arith.constant 6 : index
    %98 = memref.load %arg1[%c2_43, %c6_44] : memref<4x32xf32, #tpu.memory_space<smem>>
    %99 = vector.broadcast %96 : f32 to vector<8x128xf32>
    %100 = arith.mulf %4, %99 : vector<8x128xf32>
    %101 = vector.broadcast %97 : f32 to vector<8x128xf32>
    %102 = arith.addf %100, %101 : vector<8x128xf32>
    %103 = math.floor %102 : vector<8x128xf32>
    %cst_45 = arith.constant 0.000000e+00 : f32
    %104 = vector.broadcast %cst_45 : f32 to vector<8x128xf32>
    %105 = arith.maximumf %104, %103 : vector<8x128xf32>
    %106 = vector.broadcast %cst : f32 to vector<8x128xf32>
    %107 = arith.minimumf %106, %105 : vector<8x128xf32>
    %108 = vector.broadcast %98 : f32 to vector<8x128xf32>
    %109 = arith.mulf %107, %108 : vector<8x128xf32>
    %110 = arith.addf %95, %109 : vector<8x128xf32>
    %c0_46 = arith.constant 0 : index
    %c7 = arith.constant 7 : index
    %111 = memref.load %arg1[%c0_46, %c7] : memref<4x32xf32, #tpu.memory_space<smem>>
    %c1_47 = arith.constant 1 : index
    %c7_48 = arith.constant 7 : index
    %112 = memref.load %arg1[%c1_47, %c7_48] : memref<4x32xf32, #tpu.memory_space<smem>>
    %c2_49 = arith.constant 2 : index
    %c7_50 = arith.constant 7 : index
    %113 = memref.load %arg1[%c2_49, %c7_50] : memref<4x32xf32, #tpu.memory_space<smem>>
    %114 = vector.broadcast %111 : f32 to vector<8x128xf32>
    %115 = arith.mulf %4, %114 : vector<8x128xf32>
    %116 = vector.broadcast %112 : f32 to vector<8x128xf32>
    %117 = arith.addf %115, %116 : vector<8x128xf32>
    %118 = math.floor %117 : vector<8x128xf32>
    %cst_51 = arith.constant 0.000000e+00 : f32
    %119 = vector.broadcast %cst_51 : f32 to vector<8x128xf32>
    %120 = arith.maximumf %119, %118 : vector<8x128xf32>
    %121 = vector.broadcast %cst : f32 to vector<8x128xf32>
    %122 = arith.minimumf %121, %120 : vector<8x128xf32>
    %123 = vector.broadcast %113 : f32 to vector<8x128xf32>
    %124 = arith.mulf %122, %123 : vector<8x128xf32>
    %125 = arith.addf %110, %124 : vector<8x128xf32>
    %c0_52 = arith.constant 0 : index
    %c8 = arith.constant 8 : index
    %126 = memref.load %arg1[%c0_52, %c8] : memref<4x32xf32, #tpu.memory_space<smem>>
    %c1_53 = arith.constant 1 : index
    %c8_54 = arith.constant 8 : index
    %127 = memref.load %arg1[%c1_53, %c8_54] : memref<4x32xf32, #tpu.memory_space<smem>>
    %c2_55 = arith.constant 2 : index
    %c8_56 = arith.constant 8 : index
    %128 = memref.load %arg1[%c2_55, %c8_56] : memref<4x32xf32, #tpu.memory_space<smem>>
    %129 = vector.broadcast %126 : f32 to vector<8x128xf32>
    %130 = arith.mulf %4, %129 : vector<8x128xf32>
    %131 = vector.broadcast %127 : f32 to vector<8x128xf32>
    %132 = arith.addf %130, %131 : vector<8x128xf32>
    %133 = math.floor %132 : vector<8x128xf32>
    %cst_57 = arith.constant 0.000000e+00 : f32
    %134 = vector.broadcast %cst_57 : f32 to vector<8x128xf32>
    %135 = arith.maximumf %134, %133 : vector<8x128xf32>
    %136 = vector.broadcast %cst : f32 to vector<8x128xf32>
    %137 = arith.minimumf %136, %135 : vector<8x128xf32>
    %138 = vector.broadcast %128 : f32 to vector<8x128xf32>
    %139 = arith.mulf %137, %138 : vector<8x128xf32>
    %140 = arith.addf %125, %139 : vector<8x128xf32>
    %c0_58 = arith.constant 0 : index
    %c9 = arith.constant 9 : index
    %141 = memref.load %arg1[%c0_58, %c9] : memref<4x32xf32, #tpu.memory_space<smem>>
    %c1_59 = arith.constant 1 : index
    %c9_60 = arith.constant 9 : index
    %142 = memref.load %arg1[%c1_59, %c9_60] : memref<4x32xf32, #tpu.memory_space<smem>>
    %c2_61 = arith.constant 2 : index
    %c9_62 = arith.constant 9 : index
    %143 = memref.load %arg1[%c2_61, %c9_62] : memref<4x32xf32, #tpu.memory_space<smem>>
    %144 = vector.broadcast %141 : f32 to vector<8x128xf32>
    %145 = arith.mulf %4, %144 : vector<8x128xf32>
    %146 = vector.broadcast %142 : f32 to vector<8x128xf32>
    %147 = arith.addf %145, %146 : vector<8x128xf32>
    %148 = math.floor %147 : vector<8x128xf32>
    %cst_63 = arith.constant 0.000000e+00 : f32
    %149 = vector.broadcast %cst_63 : f32 to vector<8x128xf32>
    %150 = arith.maximumf %149, %148 : vector<8x128xf32>
    %151 = vector.broadcast %cst : f32 to vector<8x128xf32>
    %152 = arith.minimumf %151, %150 : vector<8x128xf32>
    %153 = vector.broadcast %143 : f32 to vector<8x128xf32>
    %154 = arith.mulf %152, %153 : vector<8x128xf32>
    %155 = arith.addf %140, %154 : vector<8x128xf32>
    %c0_64 = arith.constant 0 : index
    %c10 = arith.constant 10 : index
    %156 = memref.load %arg1[%c0_64, %c10] : memref<4x32xf32, #tpu.memory_space<smem>>
    %c1_65 = arith.constant 1 : index
    %c10_66 = arith.constant 10 : index
    %157 = memref.load %arg1[%c1_65, %c10_66] : memref<4x32xf32, #tpu.memory_space<smem>>
    %c2_67 = arith.constant 2 : index
    %c10_68 = arith.constant 10 : index
    %158 = memref.load %arg1[%c2_67, %c10_68] : memref<4x32xf32, #tpu.memory_space<smem>>
    %159 = vector.broadcast %156 : f32 to vector<8x128xf32>
    %160 = arith.mulf %4, %159 : vector<8x128xf32>
    %161 = vector.broadcast %157 : f32 to vector<8x128xf32>
    %162 = arith.addf %160, %161 : vector<8x128xf32>
    %163 = math.floor %162 : vector<8x128xf32>
    %cst_69 = arith.constant 0.000000e+00 : f32
    %164 = vector.broadcast %cst_69 : f32 to vector<8x128xf32>
    %165 = arith.maximumf %164, %163 : vector<8x128xf32>
    %166 = vector.broadcast %cst : f32 to vector<8x128xf32>
    %167 = arith.minimumf %166, %165 : vector<8x128xf32>
    %168 = vector.broadcast %158 : f32 to vector<8x128xf32>
    %169 = arith.mulf %167, %168 : vector<8x128xf32>
    %170 = arith.addf %155, %169 : vector<8x128xf32>
    %c0_70 = arith.constant 0 : index
    %c11 = arith.constant 11 : index
    %171 = memref.load %arg1[%c0_70, %c11] : memref<4x32xf32, #tpu.memory_space<smem>>
    %c1_71 = arith.constant 1 : index
    %c11_72 = arith.constant 11 : index
    %172 = memref.load %arg1[%c1_71, %c11_72] : memref<4x32xf32, #tpu.memory_space<smem>>
    %c2_73 = arith.constant 2 : index
    %c11_74 = arith.constant 11 : index
    %173 = memref.load %arg1[%c2_73, %c11_74] : memref<4x32xf32, #tpu.memory_space<smem>>
    %174 = vector.broadcast %171 : f32 to vector<8x128xf32>
    %175 = arith.mulf %4, %174 : vector<8x128xf32>
    %176 = vector.broadcast %172 : f32 to vector<8x128xf32>
    %177 = arith.addf %175, %176 : vector<8x128xf32>
    %178 = math.floor %177 : vector<8x128xf32>
    %cst_75 = arith.constant 0.000000e+00 : f32
    %179 = vector.broadcast %cst_75 : f32 to vector<8x128xf32>
    %180 = arith.maximumf %179, %178 : vector<8x128xf32>
    %181 = vector.broadcast %cst : f32 to vector<8x128xf32>
    %182 = arith.minimumf %181, %180 : vector<8x128xf32>
    %183 = vector.broadcast %173 : f32 to vector<8x128xf32>
    %184 = arith.mulf %182, %183 : vector<8x128xf32>
    %185 = arith.addf %170, %184 : vector<8x128xf32>
    %c0_76 = arith.constant 0 : index
    %c12 = arith.constant 12 : index
    %186 = memref.load %arg1[%c0_76, %c12] : memref<4x32xf32, #tpu.memory_space<smem>>
    %c1_77 = arith.constant 1 : index
    %c12_78 = arith.constant 12 : index
    %187 = memref.load %arg1[%c1_77, %c12_78] : memref<4x32xf32, #tpu.memory_space<smem>>
    %c2_79 = arith.constant 2 : index
    %c12_80 = arith.constant 12 : index
    %188 = memref.load %arg1[%c2_79, %c12_80] : memref<4x32xf32, #tpu.memory_space<smem>>
    %189 = vector.broadcast %186 : f32 to vector<8x128xf32>
    %190 = arith.mulf %4, %189 : vector<8x128xf32>
    %191 = vector.broadcast %187 : f32 to vector<8x128xf32>
    %192 = arith.addf %190, %191 : vector<8x128xf32>
    %193 = math.floor %192 : vector<8x128xf32>
    %cst_81 = arith.constant 0.000000e+00 : f32
    %194 = vector.broadcast %cst_81 : f32 to vector<8x128xf32>
    %195 = arith.maximumf %194, %193 : vector<8x128xf32>
    %196 = vector.broadcast %cst : f32 to vector<8x128xf32>
    %197 = arith.minimumf %196, %195 : vector<8x128xf32>
    %198 = vector.broadcast %188 : f32 to vector<8x128xf32>
    %199 = arith.mulf %197, %198 : vector<8x128xf32>
    %200 = arith.addf %185, %199 : vector<8x128xf32>
    %c0_82 = arith.constant 0 : index
    %c13 = arith.constant 13 : index
    %201 = memref.load %arg1[%c0_82, %c13] : memref<4x32xf32, #tpu.memory_space<smem>>
    %c1_83 = arith.constant 1 : index
    %c13_84 = arith.constant 13 : index
    %202 = memref.load %arg1[%c1_83, %c13_84] : memref<4x32xf32, #tpu.memory_space<smem>>
    %c2_85 = arith.constant 2 : index
    %c13_86 = arith.constant 13 : index
    %203 = memref.load %arg1[%c2_85, %c13_86] : memref<4x32xf32, #tpu.memory_space<smem>>
    %204 = vector.broadcast %201 : f32 to vector<8x128xf32>
    %205 = arith.mulf %4, %204 : vector<8x128xf32>
    %206 = vector.broadcast %202 : f32 to vector<8x128xf32>
    %207 = arith.addf %205, %206 : vector<8x128xf32>
    %208 = math.floor %207 : vector<8x128xf32>
    %cst_87 = arith.constant 0.000000e+00 : f32
    %209 = vector.broadcast %cst_87 : f32 to vector<8x128xf32>
    %210 = arith.maximumf %209, %208 : vector<8x128xf32>
    %211 = vector.broadcast %cst : f32 to vector<8x128xf32>
    %212 = arith.minimumf %211, %210 : vector<8x128xf32>
    %213 = vector.broadcast %203 : f32 to vector<8x128xf32>
    %214 = arith.mulf %212, %213 : vector<8x128xf32>
    %215 = arith.addf %200, %214 : vector<8x128xf32>
    %c0_88 = arith.constant 0 : index
    %c14 = arith.constant 14 : index
    %216 = memref.load %arg1[%c0_88, %c14] : memref<4x32xf32, #tpu.memory_space<smem>>
    %c1_89 = arith.constant 1 : index
    %c14_90 = arith.constant 14 : index
    %217 = memref.load %arg1[%c1_89, %c14_90] : memref<4x32xf32, #tpu.memory_space<smem>>
    %c2_91 = arith.constant 2 : index
    %c14_92 = arith.constant 14 : index
    %218 = memref.load %arg1[%c2_91, %c14_92] : memref<4x32xf32, #tpu.memory_space<smem>>
    %219 = vector.broadcast %216 : f32 to vector<8x128xf32>
    %220 = arith.mulf %4, %219 : vector<8x128xf32>
    %221 = vector.broadcast %217 : f32 to vector<8x128xf32>
    %222 = arith.addf %220, %221 : vector<8x128xf32>
    %223 = math.floor %222 : vector<8x128xf32>
    %cst_93 = arith.constant 0.000000e+00 : f32
    %224 = vector.broadcast %cst_93 : f32 to vector<8x128xf32>
    %225 = arith.maximumf %224, %223 : vector<8x128xf32>
    %226 = vector.broadcast %cst : f32 to vector<8x128xf32>
    %227 = arith.minimumf %226, %225 : vector<8x128xf32>
    %228 = vector.broadcast %218 : f32 to vector<8x128xf32>
    %229 = arith.mulf %227, %228 : vector<8x128xf32>
    %230 = arith.addf %215, %229 : vector<8x128xf32>
    %c0_94 = arith.constant 0 : index
    %c15 = arith.constant 15 : index
    %231 = memref.load %arg1[%c0_94, %c15] : memref<4x32xf32, #tpu.memory_space<smem>>
    %c1_95 = arith.constant 1 : index
    %c15_96 = arith.constant 15 : index
    %232 = memref.load %arg1[%c1_95, %c15_96] : memref<4x32xf32, #tpu.memory_space<smem>>
    %c2_97 = arith.constant 2 : index
    %c15_98 = arith.constant 15 : index
    %233 = memref.load %arg1[%c2_97, %c15_98] : memref<4x32xf32, #tpu.memory_space<smem>>
    %234 = vector.broadcast %231 : f32 to vector<8x128xf32>
    %235 = arith.mulf %4, %234 : vector<8x128xf32>
    %236 = vector.broadcast %232 : f32 to vector<8x128xf32>
    %237 = arith.addf %235, %236 : vector<8x128xf32>
    %238 = math.floor %237 : vector<8x128xf32>
    %cst_99 = arith.constant 0.000000e+00 : f32
    %239 = vector.broadcast %cst_99 : f32 to vector<8x128xf32>
    %240 = arith.maximumf %239, %238 : vector<8x128xf32>
    %241 = vector.broadcast %cst : f32 to vector<8x128xf32>
    %242 = arith.minimumf %241, %240 : vector<8x128xf32>
    %243 = vector.broadcast %233 : f32 to vector<8x128xf32>
    %244 = arith.mulf %242, %243 : vector<8x128xf32>
    %245 = arith.addf %230, %244 : vector<8x128xf32>
    %c0_100 = arith.constant 0 : index
    %c16 = arith.constant 16 : index
    %246 = memref.load %arg1[%c0_100, %c16] : memref<4x32xf32, #tpu.memory_space<smem>>
    %c1_101 = arith.constant 1 : index
    %c16_102 = arith.constant 16 : index
    %247 = memref.load %arg1[%c1_101, %c16_102] : memref<4x32xf32, #tpu.memory_space<smem>>
    %c2_103 = arith.constant 2 : index
    %c16_104 = arith.constant 16 : index
    %248 = memref.load %arg1[%c2_103, %c16_104] : memref<4x32xf32, #tpu.memory_space<smem>>
    %249 = vector.broadcast %246 : f32 to vector<8x128xf32>
    %250 = arith.mulf %4, %249 : vector<8x128xf32>
    %251 = vector.broadcast %247 : f32 to vector<8x128xf32>
    %252 = arith.addf %250, %251 : vector<8x128xf32>
    %253 = math.floor %252 : vector<8x128xf32>
    %cst_105 = arith.constant 0.000000e+00 : f32
    %254 = vector.broadcast %cst_105 : f32 to vector<8x128xf32>
    %255 = arith.maximumf %254, %253 : vector<8x128xf32>
    %256 = vector.broadcast %cst : f32 to vector<8x128xf32>
    %257 = arith.minimumf %256, %255 : vector<8x128xf32>
    %258 = vector.broadcast %248 : f32 to vector<8x128xf32>
    %259 = arith.mulf %257, %258 : vector<8x128xf32>
    %260 = arith.addf %245, %259 : vector<8x128xf32>
    %c0_106 = arith.constant 0 : index
    %c17 = arith.constant 17 : index
    %261 = memref.load %arg1[%c0_106, %c17] : memref<4x32xf32, #tpu.memory_space<smem>>
    %c1_107 = arith.constant 1 : index
    %c17_108 = arith.constant 17 : index
    %262 = memref.load %arg1[%c1_107, %c17_108] : memref<4x32xf32, #tpu.memory_space<smem>>
    %c2_109 = arith.constant 2 : index
    %c17_110 = arith.constant 17 : index
    %263 = memref.load %arg1[%c2_109, %c17_110] : memref<4x32xf32, #tpu.memory_space<smem>>
    %264 = vector.broadcast %261 : f32 to vector<8x128xf32>
    %265 = arith.mulf %4, %264 : vector<8x128xf32>
    %266 = vector.broadcast %262 : f32 to vector<8x128xf32>
    %267 = arith.addf %265, %266 : vector<8x128xf32>
    %268 = math.floor %267 : vector<8x128xf32>
    %cst_111 = arith.constant 0.000000e+00 : f32
    %269 = vector.broadcast %cst_111 : f32 to vector<8x128xf32>
    %270 = arith.maximumf %269, %268 : vector<8x128xf32>
    %271 = vector.broadcast %cst : f32 to vector<8x128xf32>
    %272 = arith.minimumf %271, %270 : vector<8x128xf32>
    %273 = vector.broadcast %263 : f32 to vector<8x128xf32>
    %274 = arith.mulf %272, %273 : vector<8x128xf32>
    %275 = arith.addf %260, %274 : vector<8x128xf32>
    %c0_112 = arith.constant 0 : index
    %c18 = arith.constant 18 : index
    %276 = memref.load %arg1[%c0_112, %c18] : memref<4x32xf32, #tpu.memory_space<smem>>
    %c1_113 = arith.constant 1 : index
    %c18_114 = arith.constant 18 : index
    %277 = memref.load %arg1[%c1_113, %c18_114] : memref<4x32xf32, #tpu.memory_space<smem>>
    %c2_115 = arith.constant 2 : index
    %c18_116 = arith.constant 18 : index
    %278 = memref.load %arg1[%c2_115, %c18_116] : memref<4x32xf32, #tpu.memory_space<smem>>
    %279 = vector.broadcast %276 : f32 to vector<8x128xf32>
    %280 = arith.mulf %4, %279 : vector<8x128xf32>
    %281 = vector.broadcast %277 : f32 to vector<8x128xf32>
    %282 = arith.addf %280, %281 : vector<8x128xf32>
    %283 = math.floor %282 : vector<8x128xf32>
    %cst_117 = arith.constant 0.000000e+00 : f32
    %284 = vector.broadcast %cst_117 : f32 to vector<8x128xf32>
    %285 = arith.maximumf %284, %283 : vector<8x128xf32>
    %286 = vector.broadcast %cst : f32 to vector<8x128xf32>
    %287 = arith.minimumf %286, %285 : vector<8x128xf32>
    %288 = vector.broadcast %278 : f32 to vector<8x128xf32>
    %289 = arith.mulf %287, %288 : vector<8x128xf32>
    %290 = arith.addf %275, %289 : vector<8x128xf32>
    %c0_118 = arith.constant 0 : index
    %c19 = arith.constant 19 : index
    %291 = memref.load %arg1[%c0_118, %c19] : memref<4x32xf32, #tpu.memory_space<smem>>
    %c1_119 = arith.constant 1 : index
    %c19_120 = arith.constant 19 : index
    %292 = memref.load %arg1[%c1_119, %c19_120] : memref<4x32xf32, #tpu.memory_space<smem>>
    %c2_121 = arith.constant 2 : index
    %c19_122 = arith.constant 19 : index
    %293 = memref.load %arg1[%c2_121, %c19_122] : memref<4x32xf32, #tpu.memory_space<smem>>
    %294 = vector.broadcast %291 : f32 to vector<8x128xf32>
    %295 = arith.mulf %4, %294 : vector<8x128xf32>
    %296 = vector.broadcast %292 : f32 to vector<8x128xf32>
    %297 = arith.addf %295, %296 : vector<8x128xf32>
    %298 = math.floor %297 : vector<8x128xf32>
    %cst_123 = arith.constant 0.000000e+00 : f32
    %299 = vector.broadcast %cst_123 : f32 to vector<8x128xf32>
    %300 = arith.maximumf %299, %298 : vector<8x128xf32>
    %301 = vector.broadcast %cst : f32 to vector<8x128xf32>
    %302 = arith.minimumf %301, %300 : vector<8x128xf32>
    %303 = vector.broadcast %293 : f32 to vector<8x128xf32>
    %304 = arith.mulf %302, %303 : vector<8x128xf32>
    %305 = arith.addf %290, %304 : vector<8x128xf32>
    %c0_124 = arith.constant 0 : index
    %c20 = arith.constant 20 : index
    %306 = memref.load %arg1[%c0_124, %c20] : memref<4x32xf32, #tpu.memory_space<smem>>
    %c1_125 = arith.constant 1 : index
    %c20_126 = arith.constant 20 : index
    %307 = memref.load %arg1[%c1_125, %c20_126] : memref<4x32xf32, #tpu.memory_space<smem>>
    %c2_127 = arith.constant 2 : index
    %c20_128 = arith.constant 20 : index
    %308 = memref.load %arg1[%c2_127, %c20_128] : memref<4x32xf32, #tpu.memory_space<smem>>
    %309 = vector.broadcast %306 : f32 to vector<8x128xf32>
    %310 = arith.mulf %4, %309 : vector<8x128xf32>
    %311 = vector.broadcast %307 : f32 to vector<8x128xf32>
    %312 = arith.addf %310, %311 : vector<8x128xf32>
    %313 = math.floor %312 : vector<8x128xf32>
    %cst_129 = arith.constant 0.000000e+00 : f32
    %314 = vector.broadcast %cst_129 : f32 to vector<8x128xf32>
    %315 = arith.maximumf %314, %313 : vector<8x128xf32>
    %316 = vector.broadcast %cst : f32 to vector<8x128xf32>
    %317 = arith.minimumf %316, %315 : vector<8x128xf32>
    %318 = vector.broadcast %308 : f32 to vector<8x128xf32>
    %319 = arith.mulf %317, %318 : vector<8x128xf32>
    %320 = arith.addf %305, %319 : vector<8x128xf32>
    %c0_130 = arith.constant 0 : index
    %c21 = arith.constant 21 : index
    %321 = memref.load %arg1[%c0_130, %c21] : memref<4x32xf32, #tpu.memory_space<smem>>
    %c1_131 = arith.constant 1 : index
    %c21_132 = arith.constant 21 : index
    %322 = memref.load %arg1[%c1_131, %c21_132] : memref<4x32xf32, #tpu.memory_space<smem>>
    %c2_133 = arith.constant 2 : index
    %c21_134 = arith.constant 21 : index
    %323 = memref.load %arg1[%c2_133, %c21_134] : memref<4x32xf32, #tpu.memory_space<smem>>
    %324 = vector.broadcast %321 : f32 to vector<8x128xf32>
    %325 = arith.mulf %4, %324 : vector<8x128xf32>
    %326 = vector.broadcast %322 : f32 to vector<8x128xf32>
    %327 = arith.addf %325, %326 : vector<8x128xf32>
    %328 = math.floor %327 : vector<8x128xf32>
    %cst_135 = arith.constant 0.000000e+00 : f32
    %329 = vector.broadcast %cst_135 : f32 to vector<8x128xf32>
    %330 = arith.maximumf %329, %328 : vector<8x128xf32>
    %331 = vector.broadcast %cst : f32 to vector<8x128xf32>
    %332 = arith.minimumf %331, %330 : vector<8x128xf32>
    %333 = vector.broadcast %323 : f32 to vector<8x128xf32>
    %334 = arith.mulf %332, %333 : vector<8x128xf32>
    %335 = arith.addf %320, %334 : vector<8x128xf32>
    %c0_136 = arith.constant 0 : index
    %c22 = arith.constant 22 : index
    %336 = memref.load %arg1[%c0_136, %c22] : memref<4x32xf32, #tpu.memory_space<smem>>
    %c1_137 = arith.constant 1 : index
    %c22_138 = arith.constant 22 : index
    %337 = memref.load %arg1[%c1_137, %c22_138] : memref<4x32xf32, #tpu.memory_space<smem>>
    %c2_139 = arith.constant 2 : index
    %c22_140 = arith.constant 22 : index
    %338 = memref.load %arg1[%c2_139, %c22_140] : memref<4x32xf32, #tpu.memory_space<smem>>
    %339 = vector.broadcast %336 : f32 to vector<8x128xf32>
    %340 = arith.mulf %4, %339 : vector<8x128xf32>
    %341 = vector.broadcast %337 : f32 to vector<8x128xf32>
    %342 = arith.addf %340, %341 : vector<8x128xf32>
    %343 = math.floor %342 : vector<8x128xf32>
    %cst_141 = arith.constant 0.000000e+00 : f32
    %344 = vector.broadcast %cst_141 : f32 to vector<8x128xf32>
    %345 = arith.maximumf %344, %343 : vector<8x128xf32>
    %346 = vector.broadcast %cst : f32 to vector<8x128xf32>
    %347 = arith.minimumf %346, %345 : vector<8x128xf32>
    %348 = vector.broadcast %338 : f32 to vector<8x128xf32>
    %349 = arith.mulf %347, %348 : vector<8x128xf32>
    %350 = arith.addf %335, %349 : vector<8x128xf32>
    %c0_142 = arith.constant 0 : index
    %c23 = arith.constant 23 : index
    %351 = memref.load %arg1[%c0_142, %c23] : memref<4x32xf32, #tpu.memory_space<smem>>
    %c1_143 = arith.constant 1 : index
    %c23_144 = arith.constant 23 : index
    %352 = memref.load %arg1[%c1_143, %c23_144] : memref<4x32xf32, #tpu.memory_space<smem>>
    %c2_145 = arith.constant 2 : index
    %c23_146 = arith.constant 23 : index
    %353 = memref.load %arg1[%c2_145, %c23_146] : memref<4x32xf32, #tpu.memory_space<smem>>
    %354 = vector.broadcast %351 : f32 to vector<8x128xf32>
    %355 = arith.mulf %4, %354 : vector<8x128xf32>
    %356 = vector.broadcast %352 : f32 to vector<8x128xf32>
    %357 = arith.addf %355, %356 : vector<8x128xf32>
    %358 = math.floor %357 : vector<8x128xf32>
    %cst_147 = arith.constant 0.000000e+00 : f32
    %359 = vector.broadcast %cst_147 : f32 to vector<8x128xf32>
    %360 = arith.maximumf %359, %358 : vector<8x128xf32>
    %361 = vector.broadcast %cst : f32 to vector<8x128xf32>
    %362 = arith.minimumf %361, %360 : vector<8x128xf32>
    %363 = vector.broadcast %353 : f32 to vector<8x128xf32>
    %364 = arith.mulf %362, %363 : vector<8x128xf32>
    %365 = arith.addf %350, %364 : vector<8x128xf32>
    %c0_148 = arith.constant 0 : index
    %c24 = arith.constant 24 : index
    %366 = memref.load %arg1[%c0_148, %c24] : memref<4x32xf32, #tpu.memory_space<smem>>
    %c1_149 = arith.constant 1 : index
    %c24_150 = arith.constant 24 : index
    %367 = memref.load %arg1[%c1_149, %c24_150] : memref<4x32xf32, #tpu.memory_space<smem>>
    %c2_151 = arith.constant 2 : index
    %c24_152 = arith.constant 24 : index
    %368 = memref.load %arg1[%c2_151, %c24_152] : memref<4x32xf32, #tpu.memory_space<smem>>
    %369 = vector.broadcast %366 : f32 to vector<8x128xf32>
    %370 = arith.mulf %4, %369 : vector<8x128xf32>
    %371 = vector.broadcast %367 : f32 to vector<8x128xf32>
    %372 = arith.addf %370, %371 : vector<8x128xf32>
    %373 = math.floor %372 : vector<8x128xf32>
    %cst_153 = arith.constant 0.000000e+00 : f32
    %374 = vector.broadcast %cst_153 : f32 to vector<8x128xf32>
    %375 = arith.maximumf %374, %373 : vector<8x128xf32>
    %376 = vector.broadcast %cst : f32 to vector<8x128xf32>
    %377 = arith.minimumf %376, %375 : vector<8x128xf32>
    %378 = vector.broadcast %368 : f32 to vector<8x128xf32>
    %379 = arith.mulf %377, %378 : vector<8x128xf32>
    %380 = arith.addf %365, %379 : vector<8x128xf32>
    %c0_154 = arith.constant 0 : index
    %c25 = arith.constant 25 : index
    %381 = memref.load %arg1[%c0_154, %c25] : memref<4x32xf32, #tpu.memory_space<smem>>
    %c1_155 = arith.constant 1 : index
    %c25_156 = arith.constant 25 : index
    %382 = memref.load %arg1[%c1_155, %c25_156] : memref<4x32xf32, #tpu.memory_space<smem>>
    %c2_157 = arith.constant 2 : index
    %c25_158 = arith.constant 25 : index
    %383 = memref.load %arg1[%c2_157, %c25_158] : memref<4x32xf32, #tpu.memory_space<smem>>
    %384 = vector.broadcast %381 : f32 to vector<8x128xf32>
    %385 = arith.mulf %4, %384 : vector<8x128xf32>
    %386 = vector.broadcast %382 : f32 to vector<8x128xf32>
    %387 = arith.addf %385, %386 : vector<8x128xf32>
    %388 = math.floor %387 : vector<8x128xf32>
    %cst_159 = arith.constant 0.000000e+00 : f32
    %389 = vector.broadcast %cst_159 : f32 to vector<8x128xf32>
    %390 = arith.maximumf %389, %388 : vector<8x128xf32>
    %391 = vector.broadcast %cst : f32 to vector<8x128xf32>
    %392 = arith.minimumf %391, %390 : vector<8x128xf32>
    %393 = vector.broadcast %383 : f32 to vector<8x128xf32>
    %394 = arith.mulf %392, %393 : vector<8x128xf32>
    %395 = arith.addf %380, %394 : vector<8x128xf32>
    %c0_160 = arith.constant 0 : index
    %c26 = arith.constant 26 : index
    %396 = memref.load %arg1[%c0_160, %c26] : memref<4x32xf32, #tpu.memory_space<smem>>
    %c1_161 = arith.constant 1 : index
    %c26_162 = arith.constant 26 : index
    %397 = memref.load %arg1[%c1_161, %c26_162] : memref<4x32xf32, #tpu.memory_space<smem>>
    %c2_163 = arith.constant 2 : index
    %c26_164 = arith.constant 26 : index
    %398 = memref.load %arg1[%c2_163, %c26_164] : memref<4x32xf32, #tpu.memory_space<smem>>
    %399 = vector.broadcast %396 : f32 to vector<8x128xf32>
    %400 = arith.mulf %4, %399 : vector<8x128xf32>
    %401 = vector.broadcast %397 : f32 to vector<8x128xf32>
    %402 = arith.addf %400, %401 : vector<8x128xf32>
    %403 = math.floor %402 : vector<8x128xf32>
    %cst_165 = arith.constant 0.000000e+00 : f32
    %404 = vector.broadcast %cst_165 : f32 to vector<8x128xf32>
    %405 = arith.maximumf %404, %403 : vector<8x128xf32>
    %406 = vector.broadcast %cst : f32 to vector<8x128xf32>
    %407 = arith.minimumf %406, %405 : vector<8x128xf32>
    %408 = vector.broadcast %398 : f32 to vector<8x128xf32>
    %409 = arith.mulf %407, %408 : vector<8x128xf32>
    %410 = arith.addf %395, %409 : vector<8x128xf32>
    %c0_166 = arith.constant 0 : index
    %c27 = arith.constant 27 : index
    %411 = memref.load %arg1[%c0_166, %c27] : memref<4x32xf32, #tpu.memory_space<smem>>
    %c1_167 = arith.constant 1 : index
    %c27_168 = arith.constant 27 : index
    %412 = memref.load %arg1[%c1_167, %c27_168] : memref<4x32xf32, #tpu.memory_space<smem>>
    %c2_169 = arith.constant 2 : index
    %c27_170 = arith.constant 27 : index
    %413 = memref.load %arg1[%c2_169, %c27_170] : memref<4x32xf32, #tpu.memory_space<smem>>
    %414 = vector.broadcast %411 : f32 to vector<8x128xf32>
    %415 = arith.mulf %4, %414 : vector<8x128xf32>
    %416 = vector.broadcast %412 : f32 to vector<8x128xf32>
    %417 = arith.addf %415, %416 : vector<8x128xf32>
    %418 = math.floor %417 : vector<8x128xf32>
    %cst_171 = arith.constant 0.000000e+00 : f32
    %419 = vector.broadcast %cst_171 : f32 to vector<8x128xf32>
    %420 = arith.maximumf %419, %418 : vector<8x128xf32>
    %421 = vector.broadcast %cst : f32 to vector<8x128xf32>
    %422 = arith.minimumf %421, %420 : vector<8x128xf32>
    %423 = vector.broadcast %413 : f32 to vector<8x128xf32>
    %424 = arith.mulf %422, %423 : vector<8x128xf32>
    %425 = arith.addf %410, %424 : vector<8x128xf32>
    %c0_172 = arith.constant 0 : index
    %c28 = arith.constant 28 : index
    %426 = memref.load %arg1[%c0_172, %c28] : memref<4x32xf32, #tpu.memory_space<smem>>
    %c1_173 = arith.constant 1 : index
    %c28_174 = arith.constant 28 : index
    %427 = memref.load %arg1[%c1_173, %c28_174] : memref<4x32xf32, #tpu.memory_space<smem>>
    %c2_175 = arith.constant 2 : index
    %c28_176 = arith.constant 28 : index
    %428 = memref.load %arg1[%c2_175, %c28_176] : memref<4x32xf32, #tpu.memory_space<smem>>
    %429 = vector.broadcast %426 : f32 to vector<8x128xf32>
    %430 = arith.mulf %4, %429 : vector<8x128xf32>
    %431 = vector.broadcast %427 : f32 to vector<8x128xf32>
    %432 = arith.addf %430, %431 : vector<8x128xf32>
    %433 = math.floor %432 : vector<8x128xf32>
    %cst_177 = arith.constant 0.000000e+00 : f32
    %434 = vector.broadcast %cst_177 : f32 to vector<8x128xf32>
    %435 = arith.maximumf %434, %433 : vector<8x128xf32>
    %436 = vector.broadcast %cst : f32 to vector<8x128xf32>
    %437 = arith.minimumf %436, %435 : vector<8x128xf32>
    %438 = vector.broadcast %428 : f32 to vector<8x128xf32>
    %439 = arith.mulf %437, %438 : vector<8x128xf32>
    %440 = arith.addf %425, %439 : vector<8x128xf32>
    %c0_178 = arith.constant 0 : index
    %c29 = arith.constant 29 : index
    %441 = memref.load %arg1[%c0_178, %c29] : memref<4x32xf32, #tpu.memory_space<smem>>
    %c1_179 = arith.constant 1 : index
    %c29_180 = arith.constant 29 : index
    %442 = memref.load %arg1[%c1_179, %c29_180] : memref<4x32xf32, #tpu.memory_space<smem>>
    %c2_181 = arith.constant 2 : index
    %c29_182 = arith.constant 29 : index
    %443 = memref.load %arg1[%c2_181, %c29_182] : memref<4x32xf32, #tpu.memory_space<smem>>
    %444 = vector.broadcast %441 : f32 to vector<8x128xf32>
    %445 = arith.mulf %4, %444 : vector<8x128xf32>
    %446 = vector.broadcast %442 : f32 to vector<8x128xf32>
    %447 = arith.addf %445, %446 : vector<8x128xf32>
    %448 = math.floor %447 : vector<8x128xf32>
    %cst_183 = arith.constant 0.000000e+00 : f32
    %449 = vector.broadcast %cst_183 : f32 to vector<8x128xf32>
    %450 = arith.maximumf %449, %448 : vector<8x128xf32>
    %451 = vector.broadcast %cst : f32 to vector<8x128xf32>
    %452 = arith.minimumf %451, %450 : vector<8x128xf32>
    %453 = vector.broadcast %443 : f32 to vector<8x128xf32>
    %454 = arith.mulf %452, %453 : vector<8x128xf32>
    %455 = arith.addf %440, %454 : vector<8x128xf32>
    %c0_184 = arith.constant 0 : index
    %c30 = arith.constant 30 : index
    %456 = memref.load %arg1[%c0_184, %c30] : memref<4x32xf32, #tpu.memory_space<smem>>
    %c1_185 = arith.constant 1 : index
    %c30_186 = arith.constant 30 : index
    %457 = memref.load %arg1[%c1_185, %c30_186] : memref<4x32xf32, #tpu.memory_space<smem>>
    %c2_187 = arith.constant 2 : index
    %c30_188 = arith.constant 30 : index
    %458 = memref.load %arg1[%c2_187, %c30_188] : memref<4x32xf32, #tpu.memory_space<smem>>
    %459 = vector.broadcast %456 : f32 to vector<8x128xf32>
    %460 = arith.mulf %4, %459 : vector<8x128xf32>
    %461 = vector.broadcast %457 : f32 to vector<8x128xf32>
    %462 = arith.addf %460, %461 : vector<8x128xf32>
    %463 = math.floor %462 : vector<8x128xf32>
    %cst_189 = arith.constant 0.000000e+00 : f32
    %464 = vector.broadcast %cst_189 : f32 to vector<8x128xf32>
    %465 = arith.maximumf %464, %463 : vector<8x128xf32>
    %466 = vector.broadcast %cst : f32 to vector<8x128xf32>
    %467 = arith.minimumf %466, %465 : vector<8x128xf32>
    %468 = vector.broadcast %458 : f32 to vector<8x128xf32>
    %469 = arith.mulf %467, %468 : vector<8x128xf32>
    %470 = arith.addf %455, %469 : vector<8x128xf32>
    %c0_190 = arith.constant 0 : index
    %c31 = arith.constant 31 : index
    %471 = memref.load %arg1[%c0_190, %c31] : memref<4x32xf32, #tpu.memory_space<smem>>
    %c1_191 = arith.constant 1 : index
    %c31_192 = arith.constant 31 : index
    %472 = memref.load %arg1[%c1_191, %c31_192] : memref<4x32xf32, #tpu.memory_space<smem>>
    %c2_193 = arith.constant 2 : index
    %c31_194 = arith.constant 31 : index
    %473 = memref.load %arg1[%c2_193, %c31_194] : memref<4x32xf32, #tpu.memory_space<smem>>
    %474 = vector.broadcast %471 : f32 to vector<8x128xf32>
    %475 = arith.mulf %4, %474 : vector<8x128xf32>
    %476 = vector.broadcast %472 : f32 to vector<8x128xf32>
    %477 = arith.addf %475, %476 : vector<8x128xf32>
    %478 = math.floor %477 : vector<8x128xf32>
    %cst_195 = arith.constant 0.000000e+00 : f32
    %479 = vector.broadcast %cst_195 : f32 to vector<8x128xf32>
    %480 = arith.maximumf %479, %478 : vector<8x128xf32>
    %481 = vector.broadcast %cst : f32 to vector<8x128xf32>
    %482 = arith.minimumf %481, %480 : vector<8x128xf32>
    %483 = vector.broadcast %473 : f32 to vector<8x128xf32>
    %484 = arith.mulf %482, %483 : vector<8x128xf32>
    %485 = arith.addf %470, %484 : vector<8x128xf32>
    %486 = vector.broadcast %0 : f32 to vector<8x128xf32>
    %487 = arith.addf %485, %486 : vector<8x128xf32>
    %488 = arith.index_cast %2 : i32 to index
    %c0_196 = arith.constant 0 : index
    %489 = vector.load %arg3[%488, %c0_196] : memref<8x128xf32, #tpu.memory_space<vmem>>, vector<8x128xf32>
    tpu.vector_store %arg3[%488, %c0_196], %487 {strides = array<i32>} : memref<8x128xf32, #tpu.memory_space<vmem>>, vector<8x128xf32>,
    %c1_i32 = arith.constant 1 : i32
    return
  }
  func.func @transform_0(%arg0: i32) -> (i32, i32) {
    %c0_i32 = arith.constant 0 : i32
    %c0_i32_0 = arith.constant 0 : i32
    %c0_i32_1 = arith.constant 0 : i32
    return %c0_i32, %c0_i32_0 : i32, i32
  }
  func.func @transform_1(%arg0: i32) -> (i32, i32) {
    %c0_i32 = arith.constant 0 : i32
    %c0_i32_0 = arith.constant 0 : i32
    return %arg0, %c0_i32 : i32, i32
  }
  func.func @transform_2(%arg0: i32) -> (i32, i32) {
    %c0_i32 = arith.constant 0 : i32
    %c0_i32_0 = arith.constant 0 : i32
    return %arg0, %c0_i32 : i32, i32
  }
}

</mosaic_0001>

<bundles_post_ra>
// kernel: tpu_custom_call.1
= control target key start
LH: loop header
LB: loop body
LE: loop exit
PB: predicated region body
PF: predicated region fallthrough
CT: control target
= control target key end

     0   :  { %7 = vsyncpa [#allocation5], 0  ;;  %s872_s0 = inlined_call_operand.hbm [shape: f32[4,32], index: 0, kind: input, shape index: {}]   ;;  %s873_s1 = inlined_call_operand.hbm [shape: f32[8,128], index: 1, kind: input, shape index: {}]   ;;  %s874_s2 = inlined_call_operand.hbm [shape: f32[8,128], index: 2, kind: output, shape index: {}]  }
   0x1   :  { %8 = vsyncpa [#allocation3], 0 }
   0x2   :  { %9 = vsyncpa [#allocation4], 0  ;;  %s15_s11 = sshll.u32 %s872_s0, 4  ;;  %s24_s14 = sshll.u32 %s873_s1, 4  ;;  %s16_s11 = int_to_ptr.hbm [resolvable:$true] %s15_s11  ;;  %s25_s14 = int_to_ptr.hbm [resolvable:$true] %s24_s14 }
   0x3   :  { %s643_s15 = smov [#allocation2]   ;;  %s644_s16 = smov [#allocation6]  }
   0x4   :  { %18 = dma.hbm_to_smem %s16_s11, 64, %s643_s15, [#allocation5]  }
   0x5   :  { %s26_s17 = sshll.u32 %s644_s16, 4  ;;  %s27_s17 = int_to_ptr.vmem [resolvable:$true] %s26_s17 }
   0x6   :  { %29 = dma.hbm_to_vmem [thread:$0]  %s25_s14, 128, %s27_s17, [#allocation3]  }
   0x7   :  { %637 = dma.done.wait [#allocation5], 64  }
   0x8   :  { %638 = vsyncadd [#allocation5], 4294967232 }
   0x9   :  { %639 = dma.done.wait [#allocation3], 128  }
   0xa   :  { %640 = vsyncadd [#allocation3], 4294967168 }
   0xb   :  { %38 = sfence }
   0xc   :  { %s41_s18 = sld [smem:[#allocation2]]  ;;  %v667_v0 = vld [vmem:[#allocation6] sm:$0xff] }
   0xd   :  { %s479_s19 = sld [smem:[#allocation2 + $0x80]] }
   0xe   :  { %s481_s0 = sld [smem:[#allocation2 + $0x1]] }
   0xf   :  { %s482_s20 = sld [smem:[#allocation2 + $0x81]] }
  0x10   :  { %s669_s21 = sld [smem:[#allocation2 + $0x100]] }
  0x11   :  { %s484_s1 = sld [smem:[#allocation2 + $0x2]] }
  0x12   :  { %v44_v1 = vstv %s41_s18  ;;  %s485_s22 = sld [smem:[#allocation2 + $0x82]] }
  0x13   :  { %v45_v2 = vmul.f32 %v44_v1, %v667_v0  ;;  %v46_v3 = vstv %s479_s19  ;;  %s672_s23 = sld [smem:[#allocation2 + $0x101]] }
  0x14   :  { %v57_v5 = vstv %s481_s0  ;;  %s487_s24 = sld [smem:[#allocation2 + $0x3]] }
  0x15   :  { %v47_v4 = vadd.f32 %v46_v3, %v45_v2  ;;  %v58_v6 = vmul.f32 %v57_v5, %v667_v0  ;;  %v59_v7 = vstv %s482_s20  ;;  %s488_s25 = sld [smem:[#allocation2 + $0x83]] }
  0x16   :  { %s675_s26 = sld [smem:[#allocation2 + $0x102]]  ;;  %v51_v16 = vstv %s669_s21 }
  0x17   :  { %v48_v8 = vfloor.f32 %v47_v4  ;;  %v60_v9 = vadd.f32 %v59_v7, %v58_v6  ;;  %v70_v10 = vstv %s484_s1  ;;  %s490_s27 = sld [smem:[#allocation2 + $0x4]] }
  0x18   :  { %v71_v12 = vmul.f32 %v70_v10, %v667_v0  ;;  %v72_v13 = vstv %s485_s22  ;;  %s491_s28 = sld [smem:[#allocation2 + $0x84]] }
  0x19   :  { %v49_v11 = vmax.f32 %v48_v8, 0.0  ;;  %v61_v14 = vfloor.f32 %v60_v9  ;;  %s678_s29 = sld [smem:[#allocation2 + $0x103]]  ;;  %v64_v22 = vstv %s672_s23 }
  0x1a   :  { %v73_v17 = vadd.f32 %v72_v13, %v71_v12  ;;  %v83_v18 = vstv %s487_s24  ;;  %s493_s30 = sld [smem:[#allocation2 + $0x5]] }
  0x1b   :  { %v50_v15 = vmin.f32 %v49_v11, 4.0  ;;  %v62_v19 = vmax.f32 %v61_v14, 0.0  ;;  %v84_v20 = vmul.f32 %v83_v18, %v667_v0  ;;  %v85_v21 = vstv %s488_s25  ;;  %s682_s3 = sld [smem:[#allocation2 + $0x85]] }
  0x1c   :  { %v74_v23 = vfloor.f32 %v73_v17  ;;  %s685_s4 = sld [smem:[#allocation2 + $0x104]]  ;;  %v77_v32 = vstv %s675_s26 }
  0x1d   :  { %v52_v24 = vmul.f32 %v51_v16, %v50_v15  ;;  %v63_v25 = vmin.f32 %v62_v19, 4.0  ;;  %v86_v26 = vadd.f32 %v85_v21, %v84_v20  ;;  %v96_v27 = vstv %s490_s27  ;;  %s496_s5 = sld [smem:[#allocation2 + $0x6]] }
  0x1e   :  { %v75_v28 = vmax.f32 %v74_v23, 0.0  ;;  %v97_v29 = vmul.f32 %v96_v27, %v667_v0  ;;  %v98_v30 = vstv %s491_s28  ;;  %s688_s6 = sld [smem:[#allocation2 + $0x86]] }
  0x1f   :  { %v65_v31 = vmul.f32 %v64_v22, %v63_v25  ;;  %v87_v33 = vfloor.f32 %v86_v26  ;;  %s691_s7 = sld [smem:[#allocation2 + $0x105]]  ;;  %v90_v42 = vstv %s678_s29 }
  0x20   :  { %v76_v34 = vmin.f32 %v75_v28, 4.0  ;;  %v99_v35 = vadd.f32 %v98_v30, %v97_v29  ;;  %v109_v36 = vstv %s493_s30  ;;  %s499_s8 = sld [smem:[#allocation2 + $0x7]] }
  0x21   :  { %v66_v37 = vadd.f32 %v65_v31, %v52_v24  ;;  %v88_v38 = vmax.f32 %v87_v33, 0.0  ;;  %v110_v39 = vmul.f32 %v109_v36, %v667_v0  ;;  %v111_v40 = vstv %s682_s3  ;;  %s695_s9 = sld [smem:[#allocation2 + $0x87]] }
  0x22   :  { %v78_v41 = vmul.f32 %v77_v32, %v76_v34  ;;  %v100_v43 = vfloor.f32 %v99_v35  ;;  %s698_s10 = sld [smem:[#allocation2 + $0x106]]  ;;  %v103_v52 = vstv %s685_s4 }
  0x23   :  { %v89_v44 = vmin.f32 %v88_v38, 4.0  ;;  %v112_v45 = vadd.f32 %v111_v40, %v110_v39  ;;  %v122_v46 = vstv %s496_s5  ;;  %s502_s11 = sld [smem:[#allocation2 + $0x8]] }
  0x24   :  { %v79_v47 = vadd.f32 %v78_v41, %v66_v37  ;;  %v101_v48 = vmax.f32 %v100_v43, 0.0  ;;  %v123_v49 = vmul.f32 %v122_v46, %v667_v0  ;;  %v124_v50 = vstv %s688_s6  ;;  %s702_s12 = sld [smem:[#allocation2 + $0x88]] }
  0x25   :  { %v91_v51 = vmul.f32 %v90_v42, %v89_v44  ;;  %v113_v53 = vfloor.f32 %v112_v45  ;;  %s705_s13 = sld [smem:[#allocation2 + $0x107]]  ;;  %v116_v62 = vstv %s691_s7 }
  0x26   :  { %v102_v54 = vmin.f32 %v101_v48, 4.0  ;;  %v125_v55 = vadd.f32 %v124_v50, %v123_v49  ;;  %v135_v56 = vstv %s499_s8  ;;  %s505_s14 = sld [smem:[#allocation2 + $0x9]] }
  0x27   :  { %v92_v57 = vadd.f32 %v91_v51, %v79_v47  ;;  %v114_v58 = vmax.f32 %v113_v53, 0.0  ;;  %v136_v59 = vmul.f32 %v135_v56, %v667_v0  ;;  %v137_v60 = vstv %s695_s9  ;;  %s709_s15 = sld [smem:[#allocation2 + $0x89]] }
  0x28   :  { %v104_v61 = vmul.f32 %v103_v52, %v102_v54  ;;  %v126_v63 = vfloor.f32 %v125_v55  ;;  %s712_s16 = sld [smem:[#allocation2 + $0x108]]  ;;  %v129_v9 = vstv %s698_s10 }
  0x29   :  { %v115_v1 = vmin.f32 %v114_v58, 4.0  ;;  %v138_v2 = vadd.f32 %v137_v60, %v136_v59  ;;  %v148_v3 = vstv %s502_s11  ;;  %s508_s17 = sld [smem:[#allocation2 + $0xa]] }
  0x2a   :  { %v105_v4 = vadd.f32 %v104_v61, %v92_v57  ;;  %v127_v5 = vmax.f32 %v126_v63, 0.0  ;;  %v149_v6 = vmul.f32 %v148_v3, %v667_v0  ;;  %v150_v7 = vstv %s702_s12  ;;  %s716_s18 = sld [smem:[#allocation2 + $0x8a]] }
  0x2b   :  { %v117_v8 = vmul.f32 %v116_v62, %v115_v1  ;;  %v139_v10 = vfloor.f32 %v138_v2  ;;  %s719_s19 = sld [smem:[#allocation2 + $0x109]]  ;;  %v142_v19 = vstv %s705_s13 }
  0x2c   :  { %v128_v11 = vmin.f32 %v127_v5, 4.0  ;;  %v151_v12 = vadd.f32 %v150_v7, %v149_v6  ;;  %v161_v13 = vstv %s505_s14  ;;  %s511_s0 = sld [smem:[#allocation2 + $0xb]] }
  0x2d   :  { %v118_v14 = vadd.f32 %v117_v8, %v105_v4  ;;  %v140_v15 = vmax.f32 %v139_v10, 0.0  ;;  %v162_v16 = vmul.f32 %v161_v13, %v667_v0  ;;  %v163_v17 = vstv %s709_s15  ;;  %s723_s20 = sld [smem:[#allocation2 + $0x8b]] }
  0x2e   :  { %v130_v18 = vmul.f32 %v129_v9, %v128_v11  ;;  %v152_v20 = vfloor.f32 %v151_v12  ;;  %s726_s21 = sld [smem:[#allocation2 + $0x10a]]  ;;  %v155_v29 = vstv %s712_s16 }
  0x2f   :  { %v141_v21 = vmin.f32 %v140_v15, 4.0  ;;  %v164_v22 = vadd.f32 %v163_v17, %v162_v16  ;;  %v174_v23 = vstv %s508_s17  ;;  %s514_s1 = sld [smem:[#allocation2 + $0xc]] }
  0x30   :  { %v131_v24 = vadd.f32 %v130_v18, %v118_v14  ;;  %v153_v25 = vmax.f32 %v152_v20, 0.0  ;;  %v175_v26 = vmul.f32 %v174_v23, %v667_v0  ;;  %v176_v27 = vstv %s716_s18  ;;  %s730_s22 = sld [smem:[#allocation2 + $0x8c]] }
  0x31   :  { %v143_v28 = vmul.f32 %v142_v19, %v141_v21  ;;  %v165_v30 = vfloor.f32 %v164_v22  ;;  %s733_s23 = sld [smem:[#allocation2 + $0x10b]]  ;;  %v168_v39 = vstv %s719_s19 }
  0x32   :  { %v154_v31 = vmin.f32 %v153_v25, 4.0  ;;  %v177_v32 = vadd.f32 %v176_v27, %v175_v26  ;;  %v187_v33 = vstv %s511_s0  ;;  %s517_s24 = sld [smem:[#allocation2 + $0xd]] }
  0x33   :  { %v144_v34 = vadd.f32 %v143_v28, %v131_v24  ;;  %v166_v35 = vmax.f32 %v165_v30, 0.0  ;;  %v188_v36 = vmul.f32 %v187_v33, %v667_v0  ;;  %v189_v37 = vstv %s723_s20  ;;  %s737_s25 = sld [smem:[#allocation2 + $0x8d]] }
  0x34   :  { %v156_v38 = vmul.f32 %v155_v29, %v154_v31  ;;  %v178_v40 = vfloor.f32 %v177_v32  ;;  %s740_s26 = sld [smem:[#allocation2 + $0x10c]]  ;;  %v181_v49 = vstv %s726_s21 }
  0x35   :  { %v167_v41 = vmin.f32 %v166_v35, 4.0  ;;  %v190_v42 = vadd.f32 %v189_v37, %v188_v36  ;;  %v200_v43 = vstv %s514_s1  ;;  %s520_s27 = sld [smem:[#allocation2 + $0xe]] }
  0x36   :  { %v157_v44 = vadd.f32 %v156_v38, %v144_v34  ;;  %v179_v45 = vmax.f32 %v178_v40, 0.0  ;;  %v201_v46 = vmul.f32 %v200_v43, %v667_v0  ;;  %v202_v47 = vstv %s730_s22  ;;  %s744_s28 = sld [smem:[#allocation2 + $0x8e]] }
  0x37   :  { %v169_v48 = vmul.f32 %v168_v39, %v167_v41  ;;  %v191_v50 = vfloor.f32 %v190_v42  ;;  %s747_s29 = sld [smem:[#allocation2 + $0x10d]]  ;;  %v194_v59 = vstv %s733_s23 }
  0x38   :  { %v180_v51 = vmin.f32 %v179_v45, 4.0  ;;  %v203_v52 = vadd.f32 %v202_v47, %v201_v46  ;;  %v213_v53 = vstv %s517_s24  ;;  %s523_s30 = sld [smem:[#allocation2 + $0xf]] }
  0x39   :  { %v170_v54 = vadd.f32 %v169_v48, %v157_v44  ;;  %v192_v55 = vmax.f32 %v191_v50, 0.0  ;;  %v214_v56 = vmul.f32 %v213_v53, %v667_v0  ;;  %v215_v57 = vstv %s737_s25  ;;  %s751_s3 = sld [smem:[#allocation2 + $0x8f]] }
  0x3a   :  { %v182_v58 = vmul.f32 %v181_v49, %v180_v51  ;;  %v204_v60 = vfloor.f32 %v203_v52  ;;  %s754_s4 = sld [smem:[#allocation2 + $0x10e]]  ;;  %v207_v6 = vstv %s740_s26 }
  0x3b   :  { %v193_v61 = vmin.f32 %v192_v55, 4.0  ;;  %v216_v62 = vadd.f32 %v215_v57, %v214_v56  ;;  %v226_v63 = vstv %s520_s27  ;;  %s526_s5 = sld [smem:[#allocation2 + $0x10]] }
  0x3c   :  { %v183_v1 = vadd.f32 %v182_v58, %v170_v54  ;;  %v205_v2 = vmax.f32 %v204_v60, 0.0  ;;  %v227_v3 = vmul.f32 %v226_v63, %v667_v0  ;;  %v228_v4 = vstv %s744_s28  ;;  %s758_s6 = sld [smem:[#allocation2 + $0x90]] }
  0x3d   :  { %v195_v5 = vmul.f32 %v194_v59, %v193_v61  ;;  %v217_v7 = vfloor.f32 %v216_v62  ;;  %s761_s7 = sld [smem:[#allocation2 + $0x10f]]  ;;  %v220_v16 = vstv %s747_s29 }
  0x3e   :  { %v206_v8 = vmin.f32 %v205_v2, 4.0  ;;  %v229_v9 = vadd.f32 %v228_v4, %v227_v3  ;;  %v239_v10 = vstv %s523_s30  ;;  %s529_s8 = sld [smem:[#allocation2 + $0x11]] }
  0x3f   :  { %v196_v11 = vadd.f32 %v195_v5, %v183_v1  ;;  %v218_v12 = vmax.f32 %v217_v7, 0.0  ;;  %v240_v13 = vmul.f32 %v239_v10, %v667_v0  ;;  %v241_v14 = vstv %s751_s3  ;;  %s765_s9 = sld [smem:[#allocation2 + $0x91]] }
  0x40   :  { %v208_v15 = vmul.f32 %v207_v6, %v206_v8  ;;  %v230_v17 = vfloor.f32 %v229_v9  ;;  %s768_s10 = sld [smem:[#allocation2 + $0x110]]  ;;  %v233_v26 = vstv %s754_s4 }
  0x41   :  { %v219_v18 = vmin.f32 %v218_v12, 4.0  ;;  %v242_v19 = vadd.f32 %v241_v14, %v240_v13  ;;  %v252_v20 = vstv %s526_s5  ;;  %s532_s11 = sld [smem:[#allocation2 + $0x12]] }
  0x42   :  { %v209_v21 = vadd.f32 %v208_v15, %v196_v11  ;;  %v231_v22 = vmax.f32 %v230_v17, 0.0  ;;  %v253_v23 = vmul.f32 %v252_v20, %v667_v0  ;;  %v254_v24 = vstv %s758_s6  ;;  %s772_s12 = sld [smem:[#allocation2 + $0x92]] }
  0x43   :  { %v221_v25 = vmul.f32 %v220_v16, %v219_v18  ;;  %v243_v27 = vfloor.f32 %v242_v19  ;;  %s775_s13 = sld [smem:[#allocation2 + $0x111]]  ;;  %v246_v36 = vstv %s761_s7 }
  0x44   :  { %v232_v28 = vmin.f32 %v231_v22, 4.0  ;;  %v255_v29 = vadd.f32 %v254_v24, %v253_v23  ;;  %v265_v30 = vstv %s529_s8  ;;  %s535_s14 = sld [smem:[#allocation2 + $0x13]] }
  0x45   :  { %v222_v31 = vadd.f32 %v221_v25, %v209_v21  ;;  %v244_v32 = vmax.f32 %v243_v27, 0.0  ;;  %v266_v33 = vmul.f32 %v265_v30, %v667_v0  ;;  %v267_v34 = vstv %s765_s9  ;;  %s779_s15 = sld [smem:[#allocation2 + $0x93]] }
  0x46   :  { %v234_v35 = vmul.f32 %v233_v26, %v232_v28  ;;  %v256_v37 = vfloor.f32 %v255_v29  ;;  %s782_s16 = sld [smem:[#allocation2 + $0x112]]  ;;  %v259_v46 = vstv %s768_s10 }
  0x47   :  { %v245_v38 = vmin.f32 %v244_v32, 4.0  ;;  %v268_v39 = vadd.f32 %v267_v34, %v266_v33  ;;  %v278_v40 = vstv %s532_s11  ;;  %s538_s17 = sld [smem:[#allocation2 + $0x14]] }
  0x48   :  { %v235_v41 = vadd.f32 %v234_v35, %v222_v31  ;;  %v257_v42 = vmax.f32 %v256_v37, 0.0  ;;  %v279_v43 = vmul.f32 %v278_v40, %v667_v0  ;;  %v280_v44 = vstv %s772_s12  ;;  %s786_s18 = sld [smem:[#allocation2 + $0x94]] }
  0x49   :  { %v247_v45 = vmul.f32 %v246_v36, %v245_v38  ;;  %v269_v47 = vfloor.f32 %v268_v39  ;;  %s789_s19 = sld [smem:[#allocation2 + $0x113]]  ;;  %v272_v56 = vstv %s775_s13 }
  0x4a   :  { %v258_v48 = vmin.f32 %v257_v42, 4.0  ;;  %v281_v49 = vadd.f32 %v280_v44, %v279_v43  ;;  %v291_v50 = vstv %s535_s14  ;;  %s541_s0 = sld [smem:[#allocation2 + $0x15]] }
  0x4b   :  { %v248_v51 = vadd.f32 %v247_v45, %v235_v41  ;;  %v270_v52 = vmax.f32 %v269_v47, 0.0  ;;  %v292_v53 = vmul.f32 %v291_v50, %v667_v0  ;;  %v293_v54 = vstv %s779_s15  ;;  %s793_s20 = sld [smem:[#allocation2 + $0x95]] }
  0x4c   :  { %v260_v55 = vmul.f32 %v259_v46, %v258_v48  ;;  %v282_v57 = vfloor.f32 %v281_v49  ;;  %s796_s21 = sld [smem:[#allocation2 + $0x114]]  ;;  %v285_v3 = vstv %s782_s16 }
  0x4d   :  { %v271_v58 = vmin.f32 %v270_v52, 4.0  ;;  %v294_v59 = vadd.f32 %v293_v54, %v292_v53  ;;  %v304_v60 = vstv %s538_s17  ;;  %s544_s1 = sld [smem:[#allocation2 + $0x16]] }
  0x4e   :  { %v261_v61 = vadd.f32 %v260_v55, %v248_v51  ;;  %v283_v62 = vmax.f32 %v282_v57, 0.0  ;;  %v305_v63 = vmul.f32 %v304_v60, %v667_v0  ;;  %v306_v1 = vstv %s786_s18  ;;  %s800_s22 = sld [smem:[#allocation2 + $0x96]] }
  0x4f   :  { %v273_v2 = vmul.f32 %v272_v56, %v271_v58  ;;  %v295_v4 = vfloor.f32 %v294_v59  ;;  %s803_s23 = sld [smem:[#allocation2 + $0x115]]  ;;  %v298_v13 = vstv %s789_s19 }
  0x50   :  { %v284_v5 = vmin.f32 %v283_v62, 4.0  ;;  %v307_v6 = vadd.f32 %v306_v1, %v305_v63  ;;  %v317_v7 = vstv %s541_s0  ;;  %s547_s24 = sld [smem:[#allocation2 + $0x17]] }
  0x51   :  { %v274_v8 = vadd.f32 %v273_v2, %v261_v61  ;;  %v296_v9 = vmax.f32 %v295_v4, 0.0  ;;  %v318_v10 = vmul.f32 %v317_v7, %v667_v0  ;;  %v319_v11 = vstv %s793_s20  ;;  %s807_s25 = sld [smem:[#allocation2 + $0x97]] }
  0x52   :  { %v286_v12 = vmul.f32 %v285_v3, %v284_v5  ;;  %v308_v14 = vfloor.f32 %v307_v6  ;;  %s810_s26 = sld [smem:[#allocation2 + $0x116]]  ;;  %v311_v23 = vstv %s796_s21 }
  0x53   :  { %v297_v15 = vmin.f32 %v296_v9, 4.0  ;;  %v320_v16 = vadd.f32 %v319_v11, %v318_v10  ;;  %v330_v17 = vstv %s544_s1  ;;  %s550_s27 = sld [smem:[#allocation2 + $0x18]] }
  0x54   :  { %v287_v18 = vadd.f32 %v286_v12, %v274_v8  ;;  %v309_v19 = vmax.f32 %v308_v14, 0.0  ;;  %v331_v20 = vmul.f32 %v330_v17, %v667_v0  ;;  %v332_v21 = vstv %s800_s22  ;;  %s814_s28 = sld [smem:[#allocation2 + $0x98]] }
  0x55   :  { %v299_v22 = vmul.f32 %v298_v13, %v297_v15  ;;  %v321_v24 = vfloor.f32 %v320_v16  ;;  %s817_s29 = sld [smem:[#allocation2 + $0x117]]  ;;  %v324_v33 = vstv %s803_s23  ;;  %s645_s23 = smov [#allocation7]  }
  0x56   :  { %v310_v25 = vmin.f32 %v309_v19, 4.0  ;;  %v333_v26 = vadd.f32 %v332_v21, %v331_v20  ;;  %v343_v27 = vstv %s547_s24  ;;  %s553_s30 = sld [smem:[#allocation2 + $0x19]]  ;;  %s465_s24 = sshll.u32 %s645_s23, 4  ;;  %s466_s24 = int_to_ptr.vmem [resolvable:$true] %s465_s24 }
  0x57   :  { %v300_v28 = vadd.f32 %v299_v22, %v287_v18  ;;  %v322_v29 = vmax.f32 %v321_v24, 0.0  ;;  %v344_v30 = vmul.f32 %v343_v27, %v667_v0  ;;  %v345_v31 = vstv %s807_s25  ;;  %s821_s3 = sld [smem:[#allocation2 + $0x99]] }
  0x58   :  { %v312_v32 = vmul.f32 %v311_v23, %v310_v25  ;;  %v334_v34 = vfloor.f32 %v333_v26  ;;  %s824_s4 = sld [smem:[#allocation2 + $0x118]]  ;;  %v337_v43 = vstv %s810_s26 }
  0x59   :  { %v323_v35 = vmin.f32 %v322_v29, 4.0  ;;  %v346_v36 = vadd.f32 %v345_v31, %v344_v30  ;;  %v356_v37 = vstv %s550_s27  ;;  %s556_s5 = sld [smem:[#allocation2 + $0x1a]]  ;;  %s467_s27 = sshll.u32 %s874_s2, 4  ;;  %s468_s27 = int_to_ptr.hbm [resolvable:$true] %s467_s27 }
  0x5a   :  { %v313_v38 = vadd.f32 %v312_v32, %v300_v28  ;;  %v335_v39 = vmax.f32 %v334_v34, 0.0  ;;  %v357_v40 = vmul.f32 %v356_v37, %v667_v0  ;;  %v358_v41 = vstv %s814_s28  ;;  %s828_s6 = sld [smem:[#allocation2 + $0x9a]] }
  0x5b   :  { %v325_v42 = vmul.f32 %v324_v33, %v323_v35  ;;  %v347_v44 = vfloor.f32 %v346_v36  ;;  %s831_s7 = sld [smem:[#allocation2 + $0x119]]  ;;  %v350_v53 = vstv %s817_s29 }
  0x5c   :  { %v336_v45 = vmin.f32 %v335_v39, 4.0  ;;  %v359_v46 = vadd.f32 %v358_v41, %v357_v40  ;;  %v369_v47 = vstv %s553_s30  ;;  %s559_s8 = sld [smem:[#allocation2 + $0x1b]] }
  0x5d   :  { %v326_v48 = vadd.f32 %v325_v42, %v313_v38  ;;  %v348_v49 = vmax.f32 %v347_v44, 0.0  ;;  %v370_v50 = vmul.f32 %v369_v47, %v667_v0  ;;  %v371_v51 = vstv %s821_s3  ;;  %s835_s9 = sld [smem:[#allocation2 + $0x9b]] }
  0x5e   :  { %v338_v52 = vmul.f32 %v337_v43, %v336_v45  ;;  %v360_v54 = vfloor.f32 %v359_v46  ;;  %s838_s10 = sld [smem:[#allocation2 + $0x11a]]  ;;  %v363_v63 = vstv %s824_s4 }
  0x5f   :  { %v349_v55 = vmin.f32 %v348_v49, 4.0  ;;  %v372_v56 = vadd.f32 %v371_v51, %v370_v50  ;;  %v382_v57 = vstv %s556_s5  ;;  %s562_s11 = sld [smem:[#allocation2 + $0x1c]] }
  0x60   :  { %v339_v58 = vadd.f32 %v338_v52, %v326_v48  ;;  %v361_v59 = vmax.f32 %v360_v54, 0.0  ;;  %v383_v60 = vmul.f32 %v382_v57, %v667_v0  ;;  %v384_v61 = vstv %s828_s6  ;;  %s842_s12 = sld [smem:[#allocation2 + $0x9c]] }
  0x61   :  { %v351_v62 = vmul.f32 %v350_v53, %v349_v55  ;;  %v373_v1 = vfloor.f32 %v372_v56  ;;  %s845_s13 = sld [smem:[#allocation2 + $0x11b]]  ;;  %v376_v10 = vstv %s831_s7 }
  0x62   :  { %v362_v2 = vmin.f32 %v361_v59, 4.0  ;;  %v385_v3 = vadd.f32 %v384_v61, %v383_v60  ;;  %v395_v4 = vstv %s559_s8  ;;  %s565_s14 = sld [smem:[#allocation2 + $0x1d]] }
  0x63   :  { %v352_v5 = vadd.f32 %v351_v62, %v339_v58  ;;  %v374_v6 = vmax.f32 %v373_v1, 0.0  ;;  %v396_v7 = vmul.f32 %v395_v4, %v667_v0  ;;  %v397_v8 = vstv %s835_s9  ;;  %s849_s15 = sld [smem:[#allocation2 + $0x9d]] }
  0x64   :  { %v364_v9 = vmul.f32 %v363_v63, %v362_v2  ;;  %v386_v11 = vfloor.f32 %v385_v3  ;;  %s852_s16 = sld [smem:[#allocation2 + $0x11c]]  ;;  %v389_v20 = vstv %s838_s10 }
  0x65   :  { %v375_v12 = vmin.f32 %v374_v6, 4.0  ;;  %v398_v13 = vadd.f32 %v397_v8, %v396_v7  ;;  %v408_v14 = vstv %s562_s11  ;;  %s568_s17 = sld [smem:[#allocation2 + $0x1e]] }
  0x66   :  { %v365_v15 = vadd.f32 %v364_v9, %v352_v5  ;;  %v387_v16 = vmax.f32 %v386_v11, 0.0  ;;  %v409_v17 = vmul.f32 %v408_v14, %v667_v0  ;;  %v410_v18 = vstv %s842_s12  ;;  %s569_s18 = sld [smem:[#allocation2 + $0x9e]] }
  0x67   :  { %v377_v19 = vmul.f32 %v376_v10, %v375_v12  ;;  %v399_v21 = vfloor.f32 %v398_v13  ;;  %s857_s19 = sld [smem:[#allocation2 + $0x11d]]  ;;  %v402_v30 = vstv %s845_s13 }
  0x68   :  { %v388_v22 = vmin.f32 %v387_v16, 4.0  ;;  %v411_v23 = vadd.f32 %v410_v18, %v409_v17  ;;  %v421_v24 = vstv %s565_s14  ;;  %s571_s0 = sld [smem:[#allocation2 + $0x1f]] }
  0x69   :  { %v378_v25 = vadd.f32 %v377_v19, %v365_v15  ;;  %v400_v26 = vmax.f32 %v399_v21, 0.0  ;;  %v422_v27 = vmul.f32 %v421_v24, %v667_v0  ;;  %v423_v28 = vstv %s849_s15  ;;  %s572_s20 = sld [smem:[#allocation2 + $0x9f]] }
  0x6a   :  { %v390_v29 = vmul.f32 %v389_v20, %v388_v22  ;;  %v412_v31 = vfloor.f32 %v411_v23  ;;  %s862_s21 = sld [smem:[#allocation2 + $0x11e]]  ;;  %v415_v40 = vstv %s852_s16 }
  0x6b   :  { %v401_v32 = vmin.f32 %v400_v26, 4.0  ;;  %v424_v33 = vadd.f32 %v423_v28, %v422_v27  ;;  %v434_v34 = vstv %s568_s17  ;;  %s573_s1 = sld [smem:[#allocation2 + $0x11f]] }
  0x6c   :  { %v391_v35 = vadd.f32 %v390_v29, %v378_v25  ;;  %v413_v36 = vmax.f32 %v412_v31, 0.0  ;;  %v435_v37 = vmul.f32 %v434_v34, %v667_v0  ;;  %v436_v38 = vstv %s569_s18  ;;  %s478_s22 = sld [smem:[#allocation2 + $0x180]] }
  0x6d   :  { %v403_v39 = vmul.f32 %v402_v30, %v401_v32  ;;  %v425_v41 = vfloor.f32 %v424_v33  ;;  %v428_v50 = vstv %s857_s19 }
  0x6e   :  { %v414_v42 = vmin.f32 %v413_v36, 4.0  ;;  %v437_v43 = vadd.f32 %v436_v38, %v435_v37  ;;  %v447_v44 = vstv %s571_s0 }
  0x6f   :  { %v404_v45 = vadd.f32 %v403_v39, %v391_v35  ;;  %v426_v46 = vmax.f32 %v425_v41, 0.0  ;;  %v448_v47 = vmul.f32 %v447_v44, %v667_v0  ;;  %v449_v48 = vstv %s572_s20 }
  0x70   :  { %v416_v49 = vmul.f32 %v415_v40, %v414_v42  ;;  %v438_v51 = vfloor.f32 %v437_v43  ;;  %v441_v57 = vstv %s862_s21 }
  0x71   :  { %v427_v52 = vmin.f32 %v426_v46, 4.0  ;;  %v450_v53 = vadd.f32 %v449_v48, %v448_v47  ;;  %v454_v63 = vstv %s573_s1 }
  0x72   :  { %v417_v54 = vadd.f32 %v416_v49, %v404_v45  ;;  %v439_v55 = vmax.f32 %v438_v51, 0.0  ;;  %v457_v3 = vstv %s478_s22 }
  0x73   :  { %v429_v56 = vmul.f32 %v428_v50, %v427_v52  ;;  %v451_v58 = vfloor.f32 %v450_v53 }
  0x74   :  { %v440_v59 = vmin.f32 %v439_v55, 4.0 }
  0x75   :  { %v430_v60 = vadd.f32 %v429_v56, %v417_v54  ;;  %v452_v61 = vmax.f32 %v451_v58, 0.0 }
  0x76   :  { %v442_v62 = vmul.f32 %v441_v57, %v440_v59 }
  0x77   :  { %v453_v1 = vmin.f32 %v452_v61, 4.0 }
  0x78   :  { %v443_v2 = vadd.f32 %v442_v62, %v430_v60 }
  0x79   :  { %v455_v0 = vmul.f32 %v454_v63, %v453_v1 }
  0x7b   :  { %v456_v4 = vadd.f32 %v455_v0, %v443_v2 }
  0x7d   :  { %v458_v5 = vadd.f32 %v457_v3, %v456_v4 }
  0x7f   :  { %459 = vst [vmem:[#allocation7] sm:$0xff] %v458_v5 }
  0x80   :  { %470 = dma.vmem_to_hbm [thread:$0]  %s466_s24, 128, %s468_s27, [#allocation4]  }
  0x81   :  { %641 = dma.done.wait [#allocation4], 128  }
  0x82   :  { %642 = vsyncadd [#allocation4], 4294967168 }
  0x83   :  { %475 = vsyncpa [#allocation3], 1 }
  0x84   :  { %476 = vsyncpa [#allocation4], 1 }
  0x85   :  { %477 = vsyncpa [#allocation5], 1 }

</bundles_post_ra>
